<compile_context>
chip_gen: v5e
topology: v5e:2x2
jax: 0.10.0
libtpu: 0.0.40
codegen_flags: <defaults>
</compile_context>

<pallas_src>
import jax
import jax.numpy as jnp
from jax.experimental import pallas as pl
from jax.experimental.pallas import tpu as pltpu


def _round_up(a, b):
    return pl.cdiv(a, b) * b


def _sublane(dtype):
    # Native sublane packing: f32 -> 8 rows, bf16 -> 16, int8 -> 32.
    return max(8, 32 // jnp.dtype(dtype).itemsize)


def _vmem_budget_bytes():
    # ~25% headroom under physical VMEM (48 MiB on v7x's 64 MiB parts,
    # 96 MiB on v5e/v6e's 128 MiB parts). Never hand the compiler the full
    # physical capacity: Mosaic needs room for internal scratch / DMA descriptors.
    try:
        cap = int(pltpu.get_tpu_info().vmem_capacity_bytes)
    except Exception:
        cap = 64 << 20  # conservative (v7x) if the query is unavailable
    return (cap * 3) // 4


# --------------------------------------------------------------------------
# Kernel 1: resident codebook, fused one-hot output (int8).
# --------------------------------------------------------------------------
def _vq_onehot_kernel(x_ref, et_ref, e2h_ref, out_ref):
    # x_ref:   (TN, D)    tile of input vectors
    # et_ref:  (D, Kp)    full codebook, pre-transposed (grid-constant block)
    # e2h_ref: (1, Kp)    0.5*||e_j||^2 (+inf sentinel in padded columns)
    # out_ref: (TN, Kp)   one-hot codes (int8)
    dots = jnp.dot(x_ref[...], et_ref[...],
                   preferred_element_type=jnp.float32)          # MXU, f32 acc
    # argmin_j ||x - e_j||^2 == argmin_j (0.5*||e_j||^2 - x.e_j); x**2 dropped.
    score = e2h_ref[...] - dots                                 # (TN, Kp) f32
    tn, kp = score.shape
    lane = jax.lax.broadcasted_iota(jnp.int32, (tn, kp), 1)
    min_s = jnp.min(score, axis=1, keepdims=True)
    # First-occurrence tie-break (matches torch.argmin): sentinel kp for non-min.
    arg = jnp.min(jnp.where(score == min_s, lane, kp), axis=1, keepdims=True)
    out_ref[...] = (lane == arg).astype(out_ref.dtype)


# --------------------------------------------------------------------------
# Kernel 2: K-tiled codebook stream, index output (for very large codebooks).
# --------------------------------------------------------------------------
def _vq_index_kernel(x_ref, et_ref, e2h_ref, idx_ref, min_sc, arg_sc):
    # x_ref:   (TN, D)   tile of input vectors (same block across the K axis)
    # et_ref:  (D, TK)   codebook slice
    # e2h_ref: (1, TK)   0.5*||e||^2 slice (+inf sentinel in padded columns)
    # idx_ref: (TN, 1)   argmin indices (written on the last K step)
    # min_sc/arg_sc: (TN, 1) running min / running argmin scratch
    kt = pl.program_id(1)
    dots = jnp.dot(x_ref[...], et_ref[...],
                   preferred_element_type=jnp.float32)
    score = e2h_ref[...] - dots
    tn, tk = score.shape
    lane = jax.lax.broadcasted_iota(jnp.int32, (tn, tk), 1)
    tmin = jnp.min(score, axis=1, keepdims=True)
    targ = jnp.min(jnp.where(score == tmin, lane, tk),
                   axis=1, keepdims=True) + kt * tk              # global code id

    @pl.when(kt == 0)
    def _():
        min_sc[...] = tmin
        arg_sc[...] = targ

    @pl.when(kt > 0)
    def _():
        better = tmin < min_sc[...]          # strict < keeps first occurrence
        min_sc[...] = jnp.where(better, tmin, min_sc[...])
        arg_sc[...] = jnp.where(better, targ, arg_sc[...])

    @pl.when(kt == pl.num_programs(1) - 1)
    def _():
        idx_ref[...] = arg_sc[...]


# --------------------------------------------------------------------------
# Wrapper.
# --------------------------------------------------------------------------
def vector_quantize(x, embedding_weight, *, out_dtype=jnp.int8,
                    matmul_dtype=None, max_tile_n=1024, tile_k=512,
                    force_index_path=False):
    """x: (N, D), embedding_weight: (K, D) -> (N, K) one-hot in `out_dtype`.

    out_dtype defaults to int8 (torch.one_hot returns int64; values identical).
    matmul_dtype (e.g. jnp.bfloat16) optionally casts operands for the MXU dots.
    """
    n, d = x.shape
    k, d2 = embedding_weight.shape
    assert d == d2

    budget = _vmem_budget_bytes()
    isz = lambda dt: jnp.dtype(dt).itemsize

    # Hoisted codebook prep (once per call, outside the grid loop).
    # TODO(synk): for a static codebook, persist it as (D, K) / jit-constant-fold
    # so the per-call HBM transpose disappears entirely.
    e2_half = 0.5 * jnp.sum(embedding_weight.astype(jnp.float32) ** 2, axis=1)
    e_t = jnp.transpose(embedding_weight)                        # (D, K)
    if matmul_dtype is not None:
        x = x.astype(matmul_dtype)
        e_t = e_t.astype(matmul_dtype)

    # ---- Decide between the resident-codebook path and the K-tiled path ----
    k_pad_main = _round_up(k, 128)
    align_main = max(_sublane(x.dtype), _sublane(out_dtype))
    # Conservative per-step footprint: constants counted double-buffered too.
    fixed_main = 2 * d * k_pad_main * isz(e_t.dtype) + 2 * 8 * k_pad_main * 4
    per_row_main = 2 * (d * isz(x.dtype) + k_pad_main * isz(out_dtype))
    tile_budget = (budget - fixed_main) // per_row_main if budget > fixed_main else 0
    needed_rows = min(128, _round_up(n, align_main))
    use_index_path = force_index_path or (tile_budget < needed_rows)

    if not use_index_path:
        # ---------------- resident codebook, fused one-hot ----------------
        k_pad = k_pad_main
        align = align_main
        n_pad = _round_up(n, align)
        tile_n = int(min(tile_budget, max_tile_n, n_pad))
        tile_n = max(align, (tile_n // align) * align)

        if n_pad != n:
            x = jnp.pad(x, ((0, n_pad - n), (0, 0)))
        if k_pad != k:
            e_t = jnp.pad(e_t, ((0, 0), (0, k_pad - k)))
            e2_half = jnp.concatenate(
                [e2_half, jnp.full((k_pad - k,), jnp.inf, jnp.float32)])
        e2_half = e2_half.reshape(1, k_pad)

        grid = (pl.cdiv(n_pad, tile_n),)
        out = pl.pallas_call(
            _vq_onehot_kernel,
            out_shape=jax.ShapeDtypeStruct((n_pad, k_pad), out_dtype),
            grid_spec=pltpu.PrefetchScalarGridSpec(
                num_scalar_prefetch=0,
                grid=grid,
                in_specs=[
                    pl.BlockSpec((tile_n, d), lambda i: (i, 0)),
                    pl.BlockSpec((d, k_pad), lambda i: (0, 0)),   # grid-constant
                    pl.BlockSpec((1, k_pad), lambda i: (0, 0)),   # grid-constant
                ],
                out_specs=pl.BlockSpec((tile_n, k_pad), lambda i: (i, 0)),
            ),
            compiler_params=pltpu.CompilerParams(
                dimension_semantics=("parallel",),
                vmem_limit_bytes=int(budget),
            ),
        )(x, e_t, e2_half)
        return out[:n, :k]

    # -------------------- K-tiled codebook, index output --------------------
    tk = max(128, min(_round_up(tile_k, 128), _round_up(k, 128)))
    k_pad = _round_up(k, tk)
    align = _sublane(x.dtype)                      # index output is int32
    n_pad = _round_up(n, align)

    fixed_idx = 2 * (d * tk * isz(e_t.dtype) + 8 * tk * 4)
    # x tile (dbuf) + idx out tile (dbuf, lane-padded) + min/arg scratch (lane-padded)
    per_row_idx = 2 * d * isz(x.dtype) + 2 * 128 * 4 + 2 * 128 * 4
    tile_n = (budget - fixed_idx) // per_row_idx if budget > fixed_idx else align
    tile_n = int(min(tile_n, max_tile_n, n_pad))
    tile_n = max(align, (tile_n // align) * align)

    if n_pad != n:
        x = jnp.pad(x, ((0, n_pad - n), (0, 0)))
    if k_pad != k:
        e_t = jnp.pad(e_t, ((0, 0), (0, k_pad - k)))
        e2_half = jnp.concatenate(
            [e2_half, jnp.full((k_pad - k,), jnp.inf, jnp.float32)])
    e2_half = e2_half.reshape(1, k_pad)

    grid = (pl.cdiv(n_pad, tile_n), k_pad // tk)
    idx = pl.pallas_call(
        _vq_index_kernel,
        out_shape=jax.ShapeDtypeStruct((n_pad, 1), jnp.int32),
        grid_spec=pltpu.PrefetchScalarGridSpec(
            num_scalar_prefetch=0,
            grid=grid,
            in_specs=[
                pl.BlockSpec((tile_n, d), lambda i, kk: (i, 0)),
                pl.BlockSpec((d, tk), lambda i, kk: (0, kk)),
                pl.BlockSpec((1, tk), lambda i, kk: (0, kk)),
            ],
            out_specs=pl.BlockSpec((tile_n, 1), lambda i, kk: (i, 0)),
            scratch_shapes=[
                pltpu.VMEM((tile_n, 1), jnp.float32),
                pltpu.VMEM((tile_n, 1), jnp.int32),
            ],
        ),
        compiler_params=pltpu.CompilerParams(
            dimension_semantics=("parallel", "arbitrary"),
            vmem_limit_bytes=int(budget),
        ),
    )(x, e_t, e2_half)
    idx = idx[:n, 0]
    # One-hot materialized outside the kernel (kernel HBM write is only N*4B).
    return jax.nn.one_hot(idx, k, dtype=out_dtype)


if __name__ == "__main__":
    # Small, module-consistent shapes: N rows of dim D quantized to K codes.
    # K=200 deliberately not a multiple of 128 to exercise lane padding + sentinel.
    N, D, K = 16, 32, 200

    key = jax.random.PRNGKey(0)
    kx, ke = jax.random.split(key)
    x = jax.random.normal(kx, (N, D), dtype=jnp.float32)
    # Deterministic "nn.Embedding" weight init (standard normal, like PyTorch default).
    embedding_weight = jax.random.normal(ke, (K, D), dtype=jnp.float32)

    # Reference in plain JAX (original PyTorch distance formulation).
    dist_ref = (
        jnp.sum(x**2, axis=1, keepdims=True)
        + jnp.sum(embedding_weight**2, axis=1)
        - 2.0 * x @ embedding_weight.T
    )
    idx_ref = jnp.argmin(dist_ref, axis=1)
    one_hot_ref = jax.nn.one_hot(idx_ref, K, dtype=jnp.int32)

    # Path 1: resident codebook, fused int8 one-hot output.
    out = jax.block_until_ready(vector_quantize(x, embedding_weight))
    assert out.shape == (N, K) and out.dtype == jnp.int8
    assert bool(jnp.all(out.astype(jnp.int32) == one_hot_ref))

    # Path 2: K-tiled index kernel + XLA one-hot (forced, small tile_k for coverage).
    out_idx = jax.block_until_ready(
        vector_quantize(x, embedding_weight, force_index_path=True, tile_k=128))
    assert out_idx.shape == (N, K) and out_idx.dtype == jnp.int8
    assert bool(jnp.all(out_idx.astype(jnp.int32) == one_hot_ref))

    print("KERNEL_OK")
</pallas_src>

<mosaic_0001>
module attributes {stable_mosaic.version = 11 : i64} {
  func.func @_vq_onehot_kernel(%arg0: i32, %arg1: memref<32x32xf32, #tpu.memory_space<vmem>>, %arg2: memref<32x256xf32, #tpu.memory_space<vmem>>, %arg3: memref<1x256xf32, #tpu.memory_space<vmem>>, %arg4: memref<32x256xi8, #tpu.memory_space<vmem>>) attributes {dimension_semantics = [#tpu.dimension_semantics<parallel>], iteration_bounds = array<i64: 1>, scalar_prefetch = 0 : i64, scratch_operands = 0 : i64, tpu.core_type = #tpu.core_type<tc>, window_params = [{transform_indices = @transform_0, window_bounds = array<i64: 32, 32>}, {pipeline_mode = #tpu.pipeline_mode<synchronous>, transform_indices = @transform_1, window_bounds = array<i64: 32, 256>}, {pipeline_mode = #tpu.pipeline_mode<synchronous>, transform_indices = @transform_2, window_bounds = array<i64: 1, 256>}, {transform_indices = @transform_3, window_bounds = array<i64: 32, 256>}]} {
    %c0 = arith.constant 0 : index
    %c0_0 = arith.constant 0 : index
    %0 = vector.load %arg1[%c0, %c0_0] : memref<32x32xf32, #tpu.memory_space<vmem>>, vector<32x32xf32>
    %c0_1 = arith.constant 0 : index
    %c0_2 = arith.constant 0 : index
    %1 = vector.load %arg2[%c0_1, %c0_2] : memref<32x256xf32, #tpu.memory_space<vmem>>, vector<32x256xf32>
    %cst = arith.constant dense<0.000000e+00> : vector<32x256xf32>
    %2 = tpu.matmul %0, %1, %cst {dimension_numbers = #tpu.dot_dimension_numbers<[1], [0], [0], [1], [0, 0, 1, 1], [], []>} : vector<32x32xf32>, vector<32x256xf32>, vector<32x256xf32> -> vector<32x256xf32>
    %c0_3 = arith.constant 0 : index
    %c0_4 = arith.constant 0 : index
    %3 = vector.load %arg3[%c0_3, %c0_4] : memref<1x256xf32, #tpu.memory_space<vmem>>, vector<1x256xf32>
    %4 = vector.broadcast %3 : vector<1x256xf32> to vector<32x256xf32>
    %5 = arith.subf %4, %2 : vector<32x256xf32>
    %6 = tpu.iota {dimensions = array<i32: 1>} : vector<32x256xi32>
    %cst_5 = arith.constant dense<0x7F800000> : vector<32xf32>
    %7 = vector.multi_reduction <minimumf>, %5, %cst_5 [1] : vector<32x256xf32> to vector<32xf32>
    %8 = vector.shape_cast %7 : vector<32xf32> to vector<32x1xf32>
    %9 = vector.broadcast %8 : vector<32x1xf32> to vector<32x256xf32>
    %10 = arith.cmpf oeq, %5, %9 : vector<32x256xf32>
    %c256_i32 = arith.constant 256 : i32
    %11 = vector.broadcast %c256_i32 : i32 to vector<32x256xi32>
    %12 = arith.select %10, %6, %11 : vector<32x256xi1>, vector<32x256xi32>
    %cst_6 = arith.constant dense<2147483647> : vector<32xi32>
    %13 = vector.multi_reduction <minsi>, %12, %cst_6 [1] : vector<32x256xi32> to vector<32xi32>
    %14 = vector.shape_cast %13 : vector<32xi32> to vector<32x1xi32>
    %15 = vector.broadcast %14 : vector<32x1xi32> to vector<32x256xi32>
    %16 = arith.cmpi eq, %6, %15 : vector<32x256xi32>
    %17 = arith.extui %16 : vector<32x256xi1> to vector<32x256xi8>
    %c0_7 = arith.constant 0 : index
    %c0_8 = arith.constant 0 : index
    %18 = vector.load %arg4[%c0_7, %c0_8] : memref<32x256xi8, #tpu.memory_space<vmem>>, vector<32x256xi8>
    tpu.vector_store %arg4[%c0_7, %c0_8], %17 {strides = array<i32>} : memref<32x256xi8, #tpu.memory_space<vmem>>, vector<32x256xi8>,
    return
  }
  func.func @transform_0(%arg0: i32) -> (i32, i32) {
    %c0_i32 = arith.constant 0 : i32
    %c0_i32_0 = arith.constant 0 : i32
    return %arg0, %c0_i32 : i32, i32
  }
  func.func @transform_1(%arg0: i32) -> (i32, i32) {
    %c0_i32 = arith.constant 0 : i32
    %c0_i32_0 = arith.constant 0 : i32
    %c0_i32_1 = arith.constant 0 : i32
    return %c0_i32, %c0_i32_0 : i32, i32
  }
  func.func @transform_2(%arg0: i32) -> (i32, i32) {
    %c0_i32 = arith.constant 0 : i32
    %c0_i32_0 = arith.constant 0 : i32
    %c0_i32_1 = arith.constant 0 : i32
    return %c0_i32, %c0_i32_0 : i32, i32
  }
  func.func @transform_3(%arg0: i32) -> (i32, i32) {
    %c0_i32 = arith.constant 0 : i32
    %c0_i32_0 = arith.constant 0 : i32
    return %arg0, %c0_i32 : i32, i32
  }
}

</mosaic_0001>

<bundles_post_ra>
// kernel: tpu_custom_call.1
= control target key start
LH: loop header
LB: loop body
LE: loop exit
PB: predicated region body
PF: predicated region fallthrough
CT: control target
= control target key end

     0   :  { %8 = vsyncpa [#allocation3], 0  ;;  %s485_s0 = inlined_call_operand.hbm [shape: f32[32,32], index: 0, kind: input, shape index: {}]   ;;  %s486_s1 = inlined_call_operand.hbm [shape: f32[32,256], index: 1, kind: input, shape index: {}]   ;;  %s487_s2 = inlined_call_operand.hbm [shape: f32[1,256], index: 2, kind: input, shape index: {}]   ;;  %s488_s3 = inlined_call_operand.hbm [shape: s8[32,256], index: 3, kind: output, shape index: {}]  }
   0x1   :  { %9 = vsyncpa [#allocation6], 0  ;;  %s28_s14 = sshll.u32 %s486_s1, 4  ;;  %s29_s14 = int_to_ptr.hbm [resolvable:$true] %s28_s14 }
   0x2   :  { %10 = vsyncpa [#allocation4], 0  ;;  %s423_s15 = smov [#allocation5]   ;;  %s15_s19 = sshll.u32 %s485_s0, 4  ;;  %s16_s19 = int_to_ptr.hbm [resolvable:$true] %s15_s19 }
   0x3   :  { %s30_s16 = sshll.u32 %s423_s15, 4  ;;  %s424_s20 = smov 256   ;;  %s31_s16 = int_to_ptr.vmem [resolvable:$true] %s30_s16 }
   0x4   :  { %s425_s21 = smov 16   ;;  %s426_s22 = smov [#allocation2]  }
   0x5   :  { %36 = dma.hbm_to_vmem [thread:$0]  %s29_s14, 1024, %s31_s16, [#allocation6], %s424_s20, %s424_s20, %s425_s21  }
   0x6   :  { %s17_s23 = sshll.u32 %s426_s22, 4  ;;  %s427_s24 = smov 128   ;;  %s18_s23 = int_to_ptr.vmem [resolvable:$true] %s17_s23 }
   0x7   :  { %s428_s25 = smov 8   ;;  %s42_s27 = sshll.u32 %s487_s2, 4  ;;  %s43_s27 = int_to_ptr.hbm [resolvable:$true] %s42_s27 }
   0x8   :  { %23 = dma.hbm_to_vmem [thread:$0]  %s16_s19, 512, %s18_s23, [#allocation3], %s427_s24, %s427_s24, %s428_s25  }
   0x9   :  { %s429_s28 = smov [#allocation7]  }
   0xa   :  { %s44_s29 = sshll.u32 %s429_s28, 4  ;;  %s45_s29 = int_to_ptr.vmem [resolvable:$true] %s44_s29 }
   0xb   :  { %47 = dma.hbm_to_vmem [thread:$0]  %s43_s27, 32, %s45_s29, [#allocation6]  }
   0xc   :  { %417 = dma.done.wait [#allocation3], 512  }
   0xd   :  { %418 = vsyncadd [#allocation3], 4294966784 }
   0xe   :  { %419 = dma.done.wait [#allocation6], 1056  }
   0xf   :  { %420 = vsyncadd [#allocation6], 4294966240  ;;  %v72_v0 = vld [vmem:[#allocation5 + $0x30] sm:$0xff]  ;;  %v73_v1 = vld [vmem:[#allocation5 + $0x38] sm:$0xff]  ;;  %vm74_vm0 = vcmask 261120   ;;  %v159_v35 = vlaneseq  ;;  %s431_s0 = smov [#allocation8]  }
  0x10   :  { %v70_v2 = vld [vmem:[#allocation5 + $0x20] sm:$0xff]  ;;  %99 = vmatpush.msra.mxu0 %v72_v0  ;;  %304 = vmatpush.msra.mxu2 %v72_v0  ;;  %v71_v3 = vld [vmem:[#allocation5 + $0x28] sm:$0xff]  ;;  %v68_v4 = vld [vmem:[#allocation5 + $0x10] sm:$0xff]  ;;  %s283_s2 = sshll.u32 %s431_s0, 4  ;;  %s285_s5 = sshll.u32 %s488_s3, 4  ;;  %s284_s2 = int_to_ptr.vmem [resolvable:$true] %s283_s2  ;;  %s286_s5 = int_to_ptr.hbm [resolvable:$true] %s285_s5 }
  0x11   :  { %128 = vmatpush.msra.mxu1 %v73_v1  ;;  %308 = vmatpush.msra.mxu3 %v73_v1  ;;  %v69_v5 = vld [vmem:[#allocation5 + $0x18] sm:$0xff]  ;;  %v66_v6 = vld [vmem:[#allocation5] sm:$0xff]  ;;  %v67_v7 = vld [vmem:[#allocation5 + $0x8] sm:$0xff]  ;;  %v461_v36 = vand.u32 127, %v159_v35 }
  0x12   :  { %100 = vmatpush.msra.mxu0 %v70_v2  ;;  %305 = vmatpush.msra.mxu2 %v70_v2  ;;  %v62_v8 = vld [vmem:[#allocation2] sm:$0xff]  ;;  %v64_v9 = vld [vmem:[#allocation2 + $0x10] sm:$0xff]  ;;  %v63_v10 = vld [vmem:[#allocation2 + $0x8] sm:$0xff] }
  0x13   :  { %129 = vmatpush.msra.mxu1 %v71_v3  ;;  %309 = vmatpush.msra.mxu3 %v71_v3  ;;  %v65_v11 = vld [vmem:[#allocation2 + $0x18] sm:$0xff]  ;;  %v145_v12 = vld [vmem:[#allocation7] sm:$0x3]  ;;  %v464_v37 = vadd.s32 128, %v461_v36 }
  0x14   :  { %101 = vmatpush.msra.mxu0 %v68_v4  ;;  %306 = vmatpush.msra.mxu2 %v68_v4  ;;  %v147_v13 = vperm.slane %v145_v12, 0  ;;  %v148_v14 = vperm.slane %v145_v12, 1 }
  0x15   :  { %130 = vmatpush.msra.mxu1 %v69_v5  ;;  %310 = vmatpush.msra.mxu3 %v69_v5 }
  0x16   :  { %102 = vmatpush.msra.mxu0 %v66_v6  ;;  %307 = vmatpush.msra.mxu2 %v66_v6 }
  0x17   :  { %131 = vmatpush.msra.mxu1 %v67_v7  ;;  %311 = vmatpush.msra.mxu3 %v67_v7 }
  0x18   :  { %296 = vmatmul.msk.f32.vlgmr.msra.gmra.mxu0 %vm74_vm0, %v62_v8  ;;  %298 = vmatmul.msk.f32.vlgmr.msra.gmra.mxu2 %vm74_vm0, %v64_v9 }
  0x19   :  { %300 = vmatmul.msk.f32.vlgmr.msra.gmra.mxu1 %vm74_vm0, %v62_v8  ;;  %302 = vmatmul.msk.f32.vlgmr.msra.gmra.mxu3 %vm74_vm0, %v64_v9 }
  0x20   :  { %297 = vmatmul.msk.f32.gmra.mxu0 %vm74_vm0, %v63_v10  ;;  %299 = vmatmul.msk.f32.gmra.mxu2 %vm74_vm0, %v65_v11 }
  0x21   :  { %301 = vmatmul.msk.f32.gmra.mxu1 %vm74_vm0, %v63_v10  ;;  %303 = vmatmul.msk.f32.gmra.mxu3 %vm74_vm0, %v65_v11 }
  0x95   :  { %v104_v15 = vpop.f32.mrf.mxu0 }
  0x96   :  { %v151_v16 = vsub.f32 %v147_v13, %v104_v15  ;;  %v133_v17 = vpop.f32.mrf.mxu1 }
  0x97   :  { %v152_v18 = vsub.f32 %v148_v14, %v133_v17 }
  0x99   :  { %v162_v19 = vmin.f32 %v151_v16, %v152_v18 }
  0x9b   :  { %163 = vmin.xlane.f32.xlu0 %v162_v19  ;;  %v110_v20 = vpop.f32.mrf.mxu2 }
  0x9c   :  { %v155_v21 = vsub.f32 %v147_v13, %v110_v20  ;;  %v139_v22 = vpop.f32.mrf.mxu3 }
  0x9d   :  { %v156_v23 = vsub.f32 %v148_v14, %v139_v22  ;;  %v107_v24 = vpop.f32.mrf.mxu0 }
  0x9e   :  { %v153_v25 = vsub.f32 %v147_v13, %v107_v24  ;;  %v136_v26 = vpop.f32.mrf.mxu1 }
  0x9f   :  { %v154_v27 = vsub.f32 %v148_v14, %v136_v26  ;;  %v168_v28 = vmin.f32 %v155_v21, %v156_v23 }
  0xa1   :  { %169 = vmin.xlane.f32.xlu1 %v168_v28  ;;  %v165_v29 = vmin.f32 %v153_v25, %v154_v27 }
  0xa3   :  { %166 = vmin.xlane.f32.xlu0 %v165_v29  ;;  %v113_v30 = vpop.f32.mrf.mxu2 }
  0xa4   :  { %v157_v31 = vsub.f32 %v147_v13, %v113_v30  ;;  %v142_v32 = vpop.f32.mrf.mxu3 }
  0xa5   :  { %v158_v33 = vsub.f32 %v148_v14, %v142_v32 }
  0xa7   :  { %v171_v34 = vmin.f32 %v157_v31, %v158_v33 }
  0xa9   :  { %172 = vmin.xlane.f32.xlu1 %v171_v34  ;;  %v430_v34 = vmov 0  }
 0x10e   :  { %v164_v38 = vpop.xlane.xlu0 %163 }
 0x10f   :  { %vm174_vm1 = vcmp.eq.f32.partialorder %v151_v16, %v164_v38  ;;  %vm175_vm2 = vcmp.eq.f32.partialorder %v152_v18, %v164_v38 }
 0x110   :  { %v182_v39 = vsel %vm174_vm1, %v461_v36, 256  ;;  %v183_v40 = vsel %vm175_vm2, %v464_v37, 256 }
 0x111   :  { %vm190_vm3 = vcmp.lt.s32.totalorder %v182_v39, %v183_v40 }
 0x112   :  { %v191_v41 = vsel %vm190_vm3, %v182_v39, %v183_v40 }
 0x113   :  { %v193_v42 = vshra.s32 %v191_v41, 16  ;;  %v192_v62 = vand.u32 65535, %v191_v41 }
 0x114   :  { %v170_v43 = vpop.xlane.xlu1 %169 }
 0x115   :  { %vm178_vm4 = vcmp.eq.f32.partialorder %v155_v21, %v170_v43  ;;  %vm179_vm5 = vcmp.eq.f32.partialorder %v156_v23, %v170_v43  ;;  %v195_v44 = vcvt.s32.f32 %v193_v42  ;;  %v194_v0 = vcvt.s32.f32 %v192_v62 }
 0x116   :  { %v186_v45 = vsel %vm178_vm4, %v461_v36, 256  ;;  %v187_v46 = vsel %vm179_vm5, %v464_v37, 256  ;;  %v167_v47 = vpop.xlane.xlu0 %166 }
 0x117   :  { %vm222_vm6 = vcmp.lt.s32.totalorder %v186_v45, %v187_v46  ;;  %vm176_vm7 = vcmp.eq.f32.partialorder %v153_v25, %v167_v47  ;;  %vm177_vm8 = vcmp.eq.f32.partialorder %v154_v27, %v167_v47  ;;  %196 = vmin.xlane.f32.xlu2 %v195_v44 }
 0x118   :  { %v184_v48 = vsel %vm176_vm7, %v461_v36, 256  ;;  %v185_v49 = vsel %vm177_vm8, %v464_v37, 256  ;;  %v223_v50 = vsel %vm222_vm6, %v186_v45, %v187_v46 }
 0x119   :  { %vm206_vm9 = vcmp.lt.s32.totalorder %v184_v48, %v185_v49  ;;  %v225_v51 = vshra.s32 %v223_v50, 16  ;;  %v224_v2 = vand.u32 65535, %v223_v50 }
 0x11a   :  { %v207_v52 = vsel %vm206_vm9, %v184_v48, %v185_v49 }
 0x11b   :  { %v227_v53 = vcvt.s32.f32 %v225_v51  ;;  %v209_v54 = vshra.s32 %v207_v52, 16  ;;  %v208_v3 = vand.u32 65535, %v207_v52  ;;  %v226_v5 = vcvt.s32.f32 %v224_v2 }
 0x11c   :  { %v173_v55 = vpop.xlane.xlu1 %172 }
 0x11d   :  { %vm180_vm10 = vcmp.eq.f32.partialorder %v157_v31, %v173_v55  ;;  %vm181_vm11 = vcmp.eq.f32.partialorder %v158_v33, %v173_v55  ;;  %228 = vmin.xlane.f32.xlu0 %v227_v53  ;;  %v211_v56 = vcvt.s32.f32 %v209_v54  ;;  %v210_v8 = vcvt.s32.f32 %v208_v3 }
 0x11e   :  { %v188_v57 = vsel %vm180_vm10, %v461_v36, 256  ;;  %v189_v58 = vsel %vm181_vm11, %v464_v37, 256 }
 0x11f   :  { %vm238_vm12 = vcmp.lt.s32.totalorder %v188_v57, %v189_v58  ;;  %212 = vmin.xlane.f32.xlu2 %v211_v56 }
 0x120   :  { %v239_v59 = vsel %vm238_vm12, %v188_v57, %v189_v58 }
 0x121   :  { %v241_v60 = vshra.s32 %v239_v59, 16  ;;  %v240_v10 = vand.u32 65535, %v239_v59 }
 0x123   :  { %v243_v61 = vcvt.s32.f32 %v241_v60  ;;  %v242_v12 = vcvt.s32.f32 %v240_v10 }
 0x125   :  { %244 = vmin.xlane.f32.xlu1 %v243_v61 }
 0x18a   :  { %v197_v63 = vpop.xlane.xlu2 %196 }
 0x18b   :  { %vm198_vm13 = vcmp.eq.f32.partialorder %v195_v44, %v197_v63  ;;  %v203_v16 = vcvt.f32.s32 %v197_v63 }
 0x18c   :  { %v199_v1 = vsel %vm198_vm13, %v194_v0, inf }
 0x18d   :  { %200 = vmin.xlane.f32.xlu2 %v199_v1  ;;  %v204_v23 = vshll.u32 %v203_v16, 16 }
 0x190   :  { %v229_v4 = vpop.xlane.xlu0 %228 }
 0x191   :  { %vm230_vm14 = vcmp.eq.f32.partialorder %v227_v53, %v229_v4  ;;  %v235_v19 = vcvt.f32.s32 %v229_v4 }
 0x192   :  { %v213_v6 = vpop.xlane.xlu2 %212  ;;  %v231_v7 = vsel %vm230_vm14, %v226_v5, inf }
 0x193   :  { %232 = vmin.xlane.f32.xlu1 %v231_v7  ;;  %vm214_vm15 = vcmp.eq.f32.partialorder %v211_v56, %v213_v6  ;;  %v219_v14 = vcvt.f32.s32 %v213_v6  ;;  %v236_v27 = vshll.u32 %v235_v19, 16 }
 0x194   :  { %v215_v9 = vsel %vm214_vm15, %v210_v8, inf }
 0x195   :  { %216 = vmin.xlane.f32.xlu0 %v215_v9  ;;  %v220_v20 = vshll.u32 %v219_v14, 16 }
 0x198   :  { %v245_v11 = vpop.xlane.xlu1 %244 }
 0x199   :  { %vm246_vm0 = vcmp.eq.f32.partialorder %v243_v61, %v245_v11  ;;  %v251_v24 = vcvt.f32.s32 %v245_v11 }
 0x19a   :  { %v247_v13 = vsel %vm246_vm0, %v242_v12, inf }
 0x19b   :  { %248 = vmin.xlane.f32.xlu2 %v247_v13  ;;  %v252_v30 = vshll.u32 %v251_v24, 16 }
 0x200   :  { %v201_v15 = vpop.xlane.xlu2 %200 }
 0x201   :  { %v202_v21 = vcvt.f32.s32 %v201_v15 }
 0x203   :  { %v205_v28 = vadd.s32 %v204_v23, %v202_v21 }
 0x205   :  { %vm254_vm3 = vcmp.eq.s32.totalorder %v461_v36, %v205_v28  ;;  %vm255_vm4 = vcmp.eq.s32.totalorder %v464_v37, %v205_v28 }
 0x206   :  { %v233_v17 = vpop.xlane.xlu1 %232 }
 0x207   :  { %v234_v25 = vcvt.f32.s32 %v233_v17 }
 0x208   :  { %v217_v18 = vpop.xlane.xlu0 %216 }
 0x209   :  { %v218_v22 = vcvt.f32.s32 %v217_v18  ;;  %v237_v31 = vadd.s32 %v236_v27, %v234_v25 }
 0x20b   :  { %v221_v26 = vadd.s32 %v220_v20, %v218_v22  ;;  %vm258_vm6 = vcmp.eq.s32.totalorder %v461_v36, %v237_v31  ;;  %vm259_vm10 = vcmp.eq.s32.totalorder %v464_v37, %v237_v31 }
 0x20d   :  { %vm256_vm1 = vcmp.eq.s32.totalorder %v461_v36, %v221_v26  ;;  %vm257_vm2 = vcmp.eq.s32.totalorder %v464_v37, %v221_v26 }
 0x20e   :  { %v249_v29 = vpop.xlane.xlu2 %248  ;;  %vm262_vm5 = vmpackc.low %vm256_vm1, %vm254_vm3 }
 0x20f   :  { %v250_v32 = vcvt.f32.s32 %v249_v29  ;;  %vm268_vm7 = vmpackc.low %vm257_vm2, %vm255_vm4  ;;  %v264_v35 = vsel %vm262_vm5, 16711935, %v430_v34 }
 0x210   :  { %v270_v39 = vsel %vm268_vm7, 16711935, %v430_v34 }
 0x211   :  { %v253_v33 = vadd.s32 %v252_v30, %v250_v32 }
 0x213   :  { %vm260_vm8 = vcmp.eq.s32.totalorder %v461_v36, %v253_v33  ;;  %vm261_vm9 = vcmp.eq.s32.totalorder %v464_v37, %v253_v33 }
 0x214   :  { %vm263_vm11 = vmpackc.low %vm260_vm8, %vm258_vm6 }
 0x215   :  { %v265_v38 = vsel %vm263_vm11, 16711935, %v430_v34  ;;  %vm269_vm12 = vmpackc.low %vm261_vm9, %vm259_vm10 }
 0x216   :  { %v266_v40 = vpack.c.b8 %v265_v38, %v264_v35  ;;  %v271_v41 = vsel %vm269_vm12, 16711935, %v430_v34 }
 0x217   :  { %v272_v42 = vpack.c.b8 %v271_v41, %v270_v39 }
 0x218   :  { %vm267_vm13 = vnez %v266_v40 }
 0x219   :  { %vm273_vm14 = vnez %v272_v42  ;;  %v274_v36 = vsel %vm267_vm13, 16843009, %v430_v34 }
 0x21a   :  { %v275_v37 = vsel %vm273_vm14, 16843009, %v430_v34  ;;  %276 = vst [vmem:[#allocation8] sm:$0xff] %v274_v36 }
 0x21b   :  { %277 = vst [vmem:[#allocation8 + $0x8] sm:$0xff] %v275_v37 }
 0x21c   :  { %288 = dma.vmem_to_hbm [thread:$0]  %s284_s2, 256, %s286_s5, [#allocation4]  }
 0x21d   :  { %421 = dma.done.wait [#allocation4], 256  }
 0x21e   :  { %422 = vsyncadd [#allocation4], 4294967040 }
 0x21f   :  { %293 = vsyncpa [#allocation3], 1 }
 0x220   :  { %294 = vsyncpa [#allocation6], 1 }
 0x221   :  { %295 = vsyncpa [#allocation4], 1 }

</bundles_post_ra>
